<compile_context>
chip_gen: v7x
topology: tpu7x:2x2x1
jax: 0.10.0
libtpu: 0.0.40
codegen_flags: <defaults>
</compile_context>

<pallas_src>
import functools
import math

import numpy as np
import jax
import jax.numpy as jnp
from jax.experimental import pallas as pl
from jax.experimental.pallas import tpu as pltpu


# Use the MXU only when the contraction size K = 4*C is large enough to pay off
# (review: prefer the VPU formulation for C below ~64).
_MXU_MIN_K = 256


def _sep_block_kernel(x_ref, w_ref, b_ref, o_ref, *, width):
    """One grid step: `nb` images of the fused (depthwise-transposed 3x3 s2 + 1x1) block.

    x_ref : (nb, C, H*W)       input, flattened row-major (p = i*W + j), lane axis = H*W
    w_ref : (4*Cout, 4*C)      fused weights; row blocks = quadrants [q00, q01, q10, q11],
                               column blocks = shifts [x, x(i+1,j), x(i,j+1), x(i+1,j+1)]
    b_ref : (4*Cout, 1)        fused bias (depthwise bias folded through the 1x1 conv)
    o_ref : (nb, 4*Cout, H*W)  quadrant images q[a,b][co, i*W+j] = y[co, 2i+a, 2j+b]
    """
    nb, C, HW = x_ref.shape
    W = width
    w = w_ref[...]                         # (4*Cout, 4*C)
    b = b_ref[...]                         # (4*Cout, 1)
    K = 4 * C
    R = w.shape[0]                         # 4 * Cout

    # Positions in the last image column have no (j+1) neighbour.
    col = jax.lax.broadcasted_iota(jnp.int32, (1, HW), 1)
    not_last_col = (col % W) != (W - 1)    # (1, HW)

    zs1 = jnp.zeros((C, 1), x_ref.dtype)
    zsW = jnp.zeros((C, W), x_ref.dtype)

    for n in range(nb):                    # small static unroll over the batch block
        x = x_ref[n]                                                   # (C, HW)
        # x_j[p]  = x[i, j+1]  (0 past the right edge): shift left by 1, mask last column.
        x_j = jnp.where(not_last_col,
                        jnp.concatenate([x[:, 1:], zs1], axis=1), 0.0)
        # x_i[p]  = x[i+1, j]  (0 past the bottom edge): shift left by one row.
        x_i = jnp.concatenate([x[:, W:], zsW], axis=1)
        # x_ij[p] = x[i+1, j+1]: row-shift of x_j (its right-edge zeros are already baked in).
        x_ij = jnp.concatenate([x_j[:, W:], zsW], axis=1)

        xs = jnp.concatenate([x, x_i, x_j, x_ij], axis=0)              # (4*C, HW)

        if K >= _MXU_MIN_K:
            # Production-sized channel counts: one lane-dense MXU matmul.
            y = jnp.dot(w, xs, preferred_element_type=jnp.float32)
        else:
            # Tiny K: the MXU would be <1% utilized; do the contraction on the VPU as a
            # weighted sum of channel planes (w is tiny, broadcast one column per step).
            y = jnp.zeros((R, HW), jnp.float32)
            for k in range(K):
                y = y + w[:, k:k + 1] * xs[k:k + 1, :]

        o_ref[n] = (y + b).astype(o_ref.dtype)


def separated_transposed_block(x_nchw, wdw, bdw, w1, b1):
    """Pallas implementation of SeparatedTransposedBlock.forward (NCHW in, NCHW out).

    x_nchw: (N, C, H, W);  wdw: (C, 1, 3, 3);  bdw: (C,);  w1: (Cout, C, 1, 1);  b1: (Cout,)
    Returns (N, Cout, 2H, 2W).
    """
    N, C, H, W = x_nchw.shape
    Cout = w1.shape[0]
    HW = H * W

    # Free reshape: keep the channel-major layout, put the (large) spatial extent on lanes.
    x_flat = x_nchw.astype(jnp.float32).reshape(N, C, HW)

    # ---- fuse depthwise-transposed weights + 1x1 conv + both biases (wrapper-side) --------
    # ConvTranspose2d(k=3, s=2, p=1, output_padding=1, groups=C) decomposes into 4 quadrants:
    #   y[2i,   2j  ] = x[i,j]*w[1,1]
    #   y[2i,   2j+1] = x[i,j]*w[1,2] + x[i,j+1]*w[1,0]
    #   y[2i+1, 2j  ] = x[i,j]*w[2,1] + x[i+1,j]*w[0,1]
    #   y[2i+1, 2j+1] = x[i,j]*w[2,2] + x[i,j+1]*w[2,0] + x[i+1,j]*w[0,2] + x[i+1,j+1]*w[0,0]
    # Pushing the 1x1 conv through every tap yields one (4*Cout, 4*C) matrix applied to the
    # channel-stacked shifts [x, x_i, x_j, x_ij].
    wdw2 = wdw[:, 0, :, :].astype(jnp.float32)              # (C, 3, 3)
    w1m = w1[:, :, 0, 0].astype(jnp.float32)                # (Cout, C)

    def tap(kh, kw):
        return w1m * wdw2[:, kh, kw][None, :]               # (Cout, C)

    zero = jnp.zeros((Cout, C), jnp.float32)
    m_x = jnp.concatenate([tap(1, 1), tap(1, 2), tap(2, 1), tap(2, 2)], axis=0)
    m_xi = jnp.concatenate([zero,      zero,      tap(0, 1), tap(0, 2)], axis=0)
    m_xj = jnp.concatenate([zero,      tap(1, 0), zero,      tap(2, 0)], axis=0)
    m_xij = jnp.concatenate([zero,     zero,      zero,      tap(0, 0)], axis=0)
    w_big = jnp.concatenate([m_x, m_xi, m_xj, m_xij], axis=1)           # (4*Cout, 4*C)

    # Fused bias (elementwise mul + sum so no low-precision XLA matmul sneaks in).
    b_fused = jnp.sum(w1m * bdw.astype(jnp.float32)[None, :], axis=1) \
        + b1.astype(jnp.float32)                                        # (Cout,)
    b_big = jnp.tile(b_fused, (4,)).reshape(4 * Cout, 1)                # (4*Cout, 1)

    # ---- batch blocking: more work per grid step, but keep >=2 steps for the 2 v7x TCs ----
    blk_bytes = 4 * HW * (C + 4 * Cout)              # f32 in + out per image
    nb = 1
    cap = max(1, N // 2)                             # leave at least 2 parallel grid steps
    for d in range(min(cap, 8), 0, -1):
        if N % d == 0 and 2 * d * blk_bytes <= (8 << 20):   # x2 for double buffering
            nb = d
            break

    kernel = functools.partial(_sep_block_kernel, width=W)

    out = pl.pallas_call(
        kernel,
        out_shape=jax.ShapeDtypeStruct((N, 4 * Cout, HW), jnp.float32),
        grid_spec=pltpu.PrefetchScalarGridSpec(
            num_scalar_prefetch=0,
            grid=(N // nb,),
            in_specs=[
                pl.BlockSpec((nb, C, HW), lambda n: (n, 0, 0)),
                pl.BlockSpec((4 * Cout, 4 * C), lambda n: (0, 0)),
                pl.BlockSpec((4 * Cout, 1), lambda n: (0, 0)),
            ],
            out_specs=pl.BlockSpec((nb, 4 * Cout, HW), lambda n: (n, 0, 0)),
        ),
        compiler_params=pltpu.CompilerParams(
            dimension_semantics=("parallel",),
            vmem_limit_bytes=32 * 1024 * 1024,
        ),
    )(x_flat, w_big, b_big)

    # Quadrant interleave (single XLA pass over the output).  Channel rows of `out` are ordered
    # (a, b, co), so: (N,4Cout,HW) -> (N,2,2,Cout,H,W) -> (N,Cout,H,2,W,2) -> (N,Cout,2H,2W).
    y = out.reshape(N, 2, 2, Cout, H, W)
    y = jnp.transpose(y, (0, 3, 4, 1, 5, 2))
    return y.reshape(N, Cout, 2 * H, 2 * W)


# ----------------------------- Upsampling decoder forward ---------------------------------

def upsampling_forward(inputs, conv1up_params, skip_chain_params, skip_chain_inds):
    """Mirrors Upsampling.forward: x, low, _ = inputs; up-chain on x; up-chains on the selected
    skip features; channel concat.  (forward() never applies `mergeout`.)"""
    x, low, _ = inputs
    for p in conv1up_params:
        x = separated_transposed_block(x, p["wdw"], p["bdw"], p["w1"], p["b1"])
    features = [x]
    for ind, chain in zip(skip_chain_inds, skip_chain_params):
        h = low[ind]
        for p in chain:
            h = separated_transposed_block(h, p["wdw"], p["bdw"], p["w1"], p["b1"])
        features.append(h)
    return jnp.concatenate(features, axis=1)


def _make_block_params(key, cin):
    cout = cin // 2                       # "halving the width"
    k1, k2, k3, k4 = jax.random.split(key, 4)
    return dict(
        wdw=(jax.random.normal(k1, (cin, 1, 3, 3)) * 0.3).astype(jnp.float32),
        bdw=(jax.random.normal(k2, (cin,)) * 0.1).astype(jnp.float32),
        w1=(jax.random.normal(k3, (cout, cin, 1, 1)) / np.sqrt(cin)).astype(jnp.float32),
        b1=(jax.random.normal(k4, (cout,)) * 0.1).astype(jnp.float32),
    )


def _make_chain_params(key, cin, stride):
    num_up = int(round(math.log2(stride)))
    assert 2 ** num_up == stride, "stride must be a power of 2"
    params, c = [], cin
    for _ in range(num_up):
        key, sub = jax.random.split(key)
        params.append(_make_block_params(sub, c))
        c //= 2
    return params


# ------------------------------------- references ------------------------------------------

def _reference_block_numpy(x, wdw, bdw, w1, b1):
    """Loop reference matching PyTorch ConvTranspose2d(3, s=2, p=1, op=1, groups=C) + 1x1 Conv2d."""
    N, C, H, W = x.shape
    dw = np.zeros((N, C, 2 * H, 2 * W), np.float32)
    for n in range(N):
        for c in range(C):
            for i in range(H):
                for j in range(W):
                    v = x[n, c, i, j]
                    for kh in range(3):
                        for kw in range(3):
                            oh, ow = 2 * i - 1 + kh, 2 * j - 1 + kw
                            if 0 <= oh < 2 * H and 0 <= ow < 2 * W:
                                dw[n, c, oh, ow] += v * wdw[c, 0, kh, kw]
    dw += bdw[None, :, None, None]
    y = np.einsum('nchw,oc->nohw', dw, w1[:, :, 0, 0]) + b1[None, :, None, None]
    return y.astype(np.float32)


def _reference_chain_numpy(x, chain_params):
    for p in chain_params:
        x = _reference_block_numpy(x, np.asarray(p["wdw"]), np.asarray(p["bdw"]),
                                   np.asarray(p["w1"]), np.asarray(p["b1"]))
    return x


if __name__ == "__main__":
    key = jax.random.PRNGKey(0)

    # ---- Test 1: single SeparatedTransposedBlock (small-C / VPU contraction path) ----
    N, C, H, W = 2, 4, 16, 16
    key, kx, kp = jax.random.split(key, 3)
    x = jax.random.normal(kx, (N, C, H, W), jnp.float32)
    p = _make_block_params(kp, C)
    y = jax.block_until_ready(
        separated_transposed_block(x, p["wdw"], p["bdw"], p["w1"], p["b1"]))
    assert y.shape == (N, C // 2, 2 * H, 2 * W), y.shape
    ref = _reference_block_numpy(np.asarray(x), np.asarray(p["wdw"]), np.asarray(p["bdw"]),
                                 np.asarray(p["w1"]), np.asarray(p["b1"]))
    np.testing.assert_allclose(np.asarray(y), ref, rtol=1e-4, atol=1e-4)

    # ---- Test 2: full Upsampling forward (head chain + skip chain + channel concat) ----
    # stride=4, inchannels=8, mergedat={0: (8, 2)}:
    #   head chain  8 -> 4 -> 2 channels, 8x8 -> 32x32
    #   skip chain  8 -> 4 channels,     16x16 -> 32x32
    #   concat      -> 6 channels at 32x32  (forward() does not apply mergeout)
    stride, inchannels = 4, 8
    mergedat = {0: (8, 2)}
    key, kx2, kl0, kc1, ks0 = jax.random.split(key, 5)
    x_main = jax.random.normal(kx2, (2, inchannels, 8, 8), jnp.float32)
    low = [jax.random.normal(kl0, (2, mergedat[0][0], 16, 16), jnp.float32)]
    conv1up_params = _make_chain_params(kc1, inchannels, stride)
    skip_chain_params = [_make_chain_params(ks0, mergedat[0][0], mergedat[0][1])]
    skip_chain_inds = [0]

    out = upsampling_forward((x_main, low, None), conv1up_params, skip_chain_params,
                             skip_chain_inds)
    out = jax.block_until_ready(out)
    head_c = inchannels // stride
    skip_c = mergedat[0][0] // mergedat[0][1]
    assert out.shape == (2, head_c + skip_c, 32, 32), out.shape

    ref_main = _reference_chain_numpy(np.asarray(x_main), conv1up_params)
    ref_skip = _reference_chain_numpy(np.asarray(low[0]), skip_chain_params[0])
    ref_out = np.concatenate([ref_main, ref_skip], axis=1)
    np.testing.assert_allclose(np.asarray(out), ref_out, rtol=1e-4, atol=1e-4)

    print("KERNEL_OK")
</pallas_src>

<mosaic_0001>
module attributes {stable_mosaic.version = 11 : i64} {
  func.func @_sep_block_kernel(%arg0: i32, %arg1: memref<1x4x256xf32, #tpu.memory_space<vmem>>, %arg2: memref<8x16xf32, #tpu.memory_space<vmem>>, %arg3: memref<8x1xf32, #tpu.memory_space<vmem>>, %arg4: memref<1x8x256xf32, #tpu.memory_space<vmem>>) attributes {dimension_semantics = [#tpu.dimension_semantics<parallel>], iteration_bounds = array<i64: 2>, scalar_prefetch = 0 : i64, scratch_operands = 0 : i64, tpu.core_type = #tpu.core_type<tc>, window_params = [{transform_indices = @transform_0, window_bounds = array<i64: 1, 4, 256>}, {pipeline_mode = #tpu.pipeline_mode<synchronous>, transform_indices = @transform_1, window_bounds = array<i64: 8, 16>}, {pipeline_mode = #tpu.pipeline_mode<synchronous>, transform_indices = @transform_2, window_bounds = array<i64: 8, 1>}, {transform_indices = @transform_3, window_bounds = array<i64: 1, 8, 256>}]} {
    %c0 = arith.constant 0 : index
    %c0_0 = arith.constant 0 : index
    %0 = vector.load %arg2[%c0, %c0_0] : memref<8x16xf32, #tpu.memory_space<vmem>>, vector<8x16xf32>
    %c0_1 = arith.constant 0 : index
    %c0_2 = arith.constant 0 : index
    %1 = vector.load %arg3[%c0_1, %c0_2] : memref<8x1xf32, #tpu.memory_space<vmem>>, vector<8x1xf32>
    %2 = tpu.iota {dimensions = array<i32: 1>} : vector<1x256xi32>
    %c16_i32 = arith.constant 16 : i32
    %c0_i32 = arith.constant 0 : i32
    %3 = arith.cmpi eq, %c16_i32, %c0_i32 : i32
    %c1_i32 = arith.constant 1 : i32
    %4 = arith.select %3, %c1_i32, %c16_i32 : i32
    %5 = vector.broadcast %4 : i32 to vector<1x256xi32>
    %6 = arith.remsi %2, %5 : vector<1x256xi32>
    %c0_i32_3 = arith.constant 0 : i32
    %7 = vector.broadcast %c0_i32_3 : i32 to vector<1x256xi32>
    %8 = arith.cmpi ne, %6, %7 : vector<1x256xi32>
    %c0_i32_4 = arith.constant 0 : i32
    %9 = vector.broadcast %c0_i32_4 : i32 to vector<1x256xi32>
    %10 = arith.cmpi slt, %6, %9 : vector<1x256xi32>
    %c0_i32_5 = arith.constant 0 : i32
    %11 = arith.cmpi slt, %4, %c0_i32_5 : i32
    %12 = vector.broadcast %11 : i1 to vector<1x256xi1>
    %13 = vector.broadcast %12 : vector<1x256xi1> to vector<1x256xi1>
    %14 = arith.xori %10, %13 : vector<1x256xi1>
    %15 = arith.andi %14, %8 : vector<1x256xi1>
    %16 = vector.broadcast %4 : i32 to vector<1x256xi32>
    %17 = arith.addi %6, %16 : vector<1x256xi32>
    %18 = arith.select %15, %17, %6 : vector<1x256xi1>, vector<1x256xi32>
    %c15_i32 = arith.constant 15 : i32
    %19 = vector.broadcast %c15_i32 : i32 to vector<1x256xi32>
    %20 = arith.cmpi ne, %18, %19 : vector<1x256xi32>
    %cst = arith.constant 0.000000e+00 : f32
    %21 = vector.broadcast %cst : f32 to vector<4x1xf32>
    %cst_6 = arith.constant 0.000000e+00 : f32
    %22 = vector.broadcast %cst_6 : f32 to vector<4x16xf32>
    %c0_7 = arith.constant 0 : index
    %c0_8 = arith.constant 0 : index
    %c0_9 = arith.constant 0 : index
    %23 = vector.load %arg1[%c0_7, %c0_8, %c0_9] : memref<1x4x256xf32, #tpu.memory_space<vmem>>, vector<1x4x256xf32>
    %24 = vector.shape_cast %23 : vector<1x4x256xf32> to vector<4x256xf32>
    %25 = vector.extract_strided_slice %24 {offsets = [0, 1], sizes = [4, 255], strides = [1, 1]} : vector<4x256xf32> to vector<4x255xf32>
    %26 = tpu.concatenate %25, %21 in 1 : vector<4x255xf32>, vector<4x1xf32> -> vector<4x256xf32>
    %cst_10 = arith.constant 0.000000e+00 : f32
    %27 = vector.shape_cast %20 : vector<1x256xi1> to vector<1x256xi1>
    %28 = vector.broadcast %27 : vector<1x256xi1> to vector<4x256xi1>
    %29 = vector.broadcast %cst_10 : f32 to vector<4x256xf32>
    %30 = arith.select %28, %26, %29 : vector<4x256xi1>, vector<4x256xf32>
    %31 = vector.extract_strided_slice %24 {offsets = [0, 16], sizes = [4, 240], strides = [1, 1]} : vector<4x256xf32> to vector<4x240xf32>
    %32 = tpu.concatenate %31, %22 in 1 : vector<4x240xf32>, vector<4x16xf32> -> vector<4x256xf32>
    %33 = vector.extract_strided_slice %30 {offsets = [0, 16], sizes = [4, 240], strides = [1, 1]} : vector<4x256xf32> to vector<4x240xf32>
    %34 = tpu.concatenate %33, %22 in 1 : vector<4x240xf32>, vector<4x16xf32> -> vector<4x256xf32>
    %35 = tpu.concatenate %24, %32, %30, %34 in 0 : vector<4x256xf32>, vector<4x256xf32>, vector<4x256xf32>, vector<4x256xf32> -> vector<16x256xf32>
    %cst_11 = arith.constant 0.000000e+00 : f32
    %36 = vector.broadcast %cst_11 : f32 to vector<8x256xf32>
    %37 = vector.extract_strided_slice %0 {offsets = [0, 0], sizes = [8, 1], strides = [1, 1]} : vector<8x16xf32> to vector<8x1xf32>
    %38 = vector.extract_strided_slice %35 {offsets = [0, 0], sizes = [1, 256], strides = [1, 1]} : vector<16x256xf32> to vector<1x256xf32>
    %39 = vector.broadcast %37 : vector<8x1xf32> to vector<8x256xf32>
    %40 = vector.broadcast %38 : vector<1x256xf32> to vector<8x256xf32>
    %41 = arith.mulf %39, %40 : vector<8x256xf32>
    %42 = arith.addf %36, %41 : vector<8x256xf32>
    %43 = vector.extract_strided_slice %0 {offsets = [0, 1], sizes = [8, 1], strides = [1, 1]} : vector<8x16xf32> to vector<8x1xf32>
    %44 = vector.extract_strided_slice %35 {offsets = [1, 0], sizes = [1, 256], strides = [1, 1]} : vector<16x256xf32> to vector<1x256xf32>
    %45 = vector.broadcast %43 : vector<8x1xf32> to vector<8x256xf32>
    %46 = vector.broadcast %44 : vector<1x256xf32> to vector<8x256xf32>
    %47 = arith.mulf %45, %46 : vector<8x256xf32>
    %48 = arith.addf %42, %47 : vector<8x256xf32>
    %49 = vector.extract_strided_slice %0 {offsets = [0, 2], sizes = [8, 1], strides = [1, 1]} : vector<8x16xf32> to vector<8x1xf32>
    %50 = vector.extract_strided_slice %35 {offsets = [2, 0], sizes = [1, 256], strides = [1, 1]} : vector<16x256xf32> to vector<1x256xf32>
    %51 = vector.broadcast %49 : vector<8x1xf32> to vector<8x256xf32>
    %52 = vector.broadcast %50 : vector<1x256xf32> to vector<8x256xf32>
    %53 = arith.mulf %51, %52 : vector<8x256xf32>
    %54 = arith.addf %48, %53 : vector<8x256xf32>
    %55 = vector.extract_strided_slice %0 {offsets = [0, 3], sizes = [8, 1], strides = [1, 1]} : vector<8x16xf32> to vector<8x1xf32>
    %56 = vector.extract_strided_slice %35 {offsets = [3, 0], sizes = [1, 256], strides = [1, 1]} : vector<16x256xf32> to vector<1x256xf32>
    %57 = vector.broadcast %55 : vector<8x1xf32> to vector<8x256xf32>
    %58 = vector.broadcast %56 : vector<1x256xf32> to vector<8x256xf32>
    %59 = arith.mulf %57, %58 : vector<8x256xf32>
    %60 = arith.addf %54, %59 : vector<8x256xf32>
    %61 = vector.extract_strided_slice %0 {offsets = [0, 4], sizes = [8, 1], strides = [1, 1]} : vector<8x16xf32> to vector<8x1xf32>
    %62 = vector.extract_strided_slice %35 {offsets = [4, 0], sizes = [1, 256], strides = [1, 1]} : vector<16x256xf32> to vector<1x256xf32>
    %63 = vector.broadcast %61 : vector<8x1xf32> to vector<8x256xf32>
    %64 = vector.broadcast %62 : vector<1x256xf32> to vector<8x256xf32>
    %65 = arith.mulf %63, %64 : vector<8x256xf32>
    %66 = arith.addf %60, %65 : vector<8x256xf32>
    %67 = vector.extract_strided_slice %0 {offsets = [0, 5], sizes = [8, 1], strides = [1, 1]} : vector<8x16xf32> to vector<8x1xf32>
    %68 = vector.extract_strided_slice %35 {offsets = [5, 0], sizes = [1, 256], strides = [1, 1]} : vector<16x256xf32> to vector<1x256xf32>
    %69 = vector.broadcast %67 : vector<8x1xf32> to vector<8x256xf32>
    %70 = vector.broadcast %68 : vector<1x256xf32> to vector<8x256xf32>
    %71 = arith.mulf %69, %70 : vector<8x256xf32>
    %72 = arith.addf %66, %71 : vector<8x256xf32>
    %73 = vector.extract_strided_slice %0 {offsets = [0, 6], sizes = [8, 1], strides = [1, 1]} : vector<8x16xf32> to vector<8x1xf32>
    %74 = vector.extract_strided_slice %35 {offsets = [6, 0], sizes = [1, 256], strides = [1, 1]} : vector<16x256xf32> to vector<1x256xf32>
    %75 = vector.broadcast %73 : vector<8x1xf32> to vector<8x256xf32>
    %76 = vector.broadcast %74 : vector<1x256xf32> to vector<8x256xf32>
    %77 = arith.mulf %75, %76 : vector<8x256xf32>
    %78 = arith.addf %72, %77 : vector<8x256xf32>
    %79 = vector.extract_strided_slice %0 {offsets = [0, 7], sizes = [8, 1], strides = [1, 1]} : vector<8x16xf32> to vector<8x1xf32>
    %80 = vector.extract_strided_slice %35 {offsets = [7, 0], sizes = [1, 256], strides = [1, 1]} : vector<16x256xf32> to vector<1x256xf32>
    %81 = vector.broadcast %79 : vector<8x1xf32> to vector<8x256xf32>
    %82 = vector.broadcast %80 : vector<1x256xf32> to vector<8x256xf32>
    %83 = arith.mulf %81, %82 : vector<8x256xf32>
    %84 = arith.addf %78, %83 : vector<8x256xf32>
    %85 = vector.extract_strided_slice %0 {offsets = [0, 8], sizes = [8, 1], strides = [1, 1]} : vector<8x16xf32> to vector<8x1xf32>
    %86 = vector.extract_strided_slice %35 {offsets = [8, 0], sizes = [1, 256], strides = [1, 1]} : vector<16x256xf32> to vector<1x256xf32>
    %87 = vector.broadcast %85 : vector<8x1xf32> to vector<8x256xf32>
    %88 = vector.broadcast %86 : vector<1x256xf32> to vector<8x256xf32>
    %89 = arith.mulf %87, %88 : vector<8x256xf32>
    %90 = arith.addf %84, %89 : vector<8x256xf32>
    %91 = vector.extract_strided_slice %0 {offsets = [0, 9], sizes = [8, 1], strides = [1, 1]} : vector<8x16xf32> to vector<8x1xf32>
    %92 = vector.extract_strided_slice %35 {offsets = [9, 0], sizes = [1, 256], strides = [1, 1]} : vector<16x256xf32> to vector<1x256xf32>
    %93 = vector.broadcast %91 : vector<8x1xf32> to vector<8x256xf32>
    %94 = vector.broadcast %92 : vector<1x256xf32> to vector<8x256xf32>
    %95 = arith.mulf %93, %94 : vector<8x256xf32>
    %96 = arith.addf %90, %95 : vector<8x256xf32>
    %97 = vector.extract_strided_slice %0 {offsets = [0, 10], sizes = [8, 1], strides = [1, 1]} : vector<8x16xf32> to vector<8x1xf32>
    %98 = vector.extract_strided_slice %35 {offsets = [10, 0], sizes = [1, 256], strides = [1, 1]} : vector<16x256xf32> to vector<1x256xf32>
    %99 = vector.broadcast %97 : vector<8x1xf32> to vector<8x256xf32>
    %100 = vector.broadcast %98 : vector<1x256xf32> to vector<8x256xf32>
    %101 = arith.mulf %99, %100 : vector<8x256xf32>
    %102 = arith.addf %96, %101 : vector<8x256xf32>
    %103 = vector.extract_strided_slice %0 {offsets = [0, 11], sizes = [8, 1], strides = [1, 1]} : vector<8x16xf32> to vector<8x1xf32>
    %104 = vector.extract_strided_slice %35 {offsets = [11, 0], sizes = [1, 256], strides = [1, 1]} : vector<16x256xf32> to vector<1x256xf32>
    %105 = vector.broadcast %103 : vector<8x1xf32> to vector<8x256xf32>
    %106 = vector.broadcast %104 : vector<1x256xf32> to vector<8x256xf32>
    %107 = arith.mulf %105, %106 : vector<8x256xf32>
    %108 = arith.addf %102, %107 : vector<8x256xf32>
    %109 = vector.extract_strided_slice %0 {offsets = [0, 12], sizes = [8, 1], strides = [1, 1]} : vector<8x16xf32> to vector<8x1xf32>
    %110 = vector.extract_strided_slice %35 {offsets = [12, 0], sizes = [1, 256], strides = [1, 1]} : vector<16x256xf32> to vector<1x256xf32>
    %111 = vector.broadcast %109 : vector<8x1xf32> to vector<8x256xf32>
    %112 = vector.broadcast %110 : vector<1x256xf32> to vector<8x256xf32>
    %113 = arith.mulf %111, %112 : vector<8x256xf32>
    %114 = arith.addf %108, %113 : vector<8x256xf32>
    %115 = vector.extract_strided_slice %0 {offsets = [0, 13], sizes = [8, 1], strides = [1, 1]} : vector<8x16xf32> to vector<8x1xf32>
    %116 = vector.extract_strided_slice %35 {offsets = [13, 0], sizes = [1, 256], strides = [1, 1]} : vector<16x256xf32> to vector<1x256xf32>
    %117 = vector.broadcast %115 : vector<8x1xf32> to vector<8x256xf32>
    %118 = vector.broadcast %116 : vector<1x256xf32> to vector<8x256xf32>
    %119 = arith.mulf %117, %118 : vector<8x256xf32>
    %120 = arith.addf %114, %119 : vector<8x256xf32>
    %121 = vector.extract_strided_slice %0 {offsets = [0, 14], sizes = [8, 1], strides = [1, 1]} : vector<8x16xf32> to vector<8x1xf32>
    %122 = vector.extract_strided_slice %35 {offsets = [14, 0], sizes = [1, 256], strides = [1, 1]} : vector<16x256xf32> to vector<1x256xf32>
    %123 = vector.broadcast %121 : vector<8x1xf32> to vector<8x256xf32>
    %124 = vector.broadcast %122 : vector<1x256xf32> to vector<8x256xf32>
    %125 = arith.mulf %123, %124 : vector<8x256xf32>
    %126 = arith.addf %120, %125 : vector<8x256xf32>
    %127 = vector.extract_strided_slice %0 {offsets = [0, 15], sizes = [8, 1], strides = [1, 1]} : vector<8x16xf32> to vector<8x1xf32>
    %128 = vector.extract_strided_slice %35 {offsets = [15, 0], sizes = [1, 256], strides = [1, 1]} : vector<16x256xf32> to vector<1x256xf32>
    %129 = vector.broadcast %127 : vector<8x1xf32> to vector<8x256xf32>
    %130 = vector.broadcast %128 : vector<1x256xf32> to vector<8x256xf32>
    %131 = arith.mulf %129, %130 : vector<8x256xf32>
    %132 = arith.addf %126, %131 : vector<8x256xf32>
    %133 = vector.broadcast %1 : vector<8x1xf32> to vector<8x256xf32>
    %134 = arith.addf %132, %133 : vector<8x256xf32>
    %c0_12 = arith.constant 0 : index
    %c0_13 = arith.constant 0 : index
    %c0_14 = arith.constant 0 : index
    %135 = vector.load %arg4[%c0_12, %c0_13, %c0_14] : memref<1x8x256xf32, #tpu.memory_space<vmem>>, vector<1x8x256xf32>
    %136 = vector.shape_cast %135 : vector<1x8x256xf32> to vector<8x256xf32>
    %137 = vector.shape_cast %134 : vector<8x256xf32> to vector<1x8x256xf32>
    tpu.vector_store %arg4[%c0_12, %c0_13, %c0_14], %137 {strides = array<i32>} : memref<1x8x256xf32, #tpu.memory_space<vmem>>, vector<1x8x256xf32>,
    return
  }
  func.func @transform_0(%arg0: i32) -> (i32, i32, i32) {
    %c0_i32 = arith.constant 0 : i32
    %c0_i32_0 = arith.constant 0 : i32
    %c0_i32_1 = arith.constant 0 : i32
    return %arg0, %c0_i32, %c0_i32_0 : i32, i32, i32
  }
  func.func @transform_1(%arg0: i32) -> (i32, i32) {
    %c0_i32 = arith.constant 0 : i32
    %c0_i32_0 = arith.constant 0 : i32
    %c0_i32_1 = arith.constant 0 : i32
    return %c0_i32, %c0_i32_0 : i32, i32
  }
  func.func @transform_2(%arg0: i32) -> (i32, i32) {
    %c0_i32 = arith.constant 0 : i32
    %c0_i32_0 = arith.constant 0 : i32
    %c0_i32_1 = arith.constant 0 : i32
    return %c0_i32, %c0_i32_0 : i32, i32
  }
  func.func @transform_3(%arg0: i32) -> (i32, i32, i32) {
    %c0_i32 = arith.constant 0 : i32
    %c0_i32_0 = arith.constant 0 : i32
    %c0_i32_1 = arith.constant 0 : i32
    return %arg0, %c0_i32, %c0_i32_0 : i32, i32, i32
  }
}

</mosaic_0001>

<bundles_post_ra>
// kernel: tpu_custom_call.1
= control target key start
LH: loop header
LB: loop body
LE: loop exit
PB: predicated region body
PF: predicated region fallthrough
CT: control target
= control target key end

     0   :  { %8 = vsyncpa [#allocation3], 0  ;;  %s1146_s0 = inlined_call_operand.hbm [shape: f32[2,4,256], index: 0, kind: input, shape index: {}]   ;;  %s1147_s1 = inlined_call_operand.vmem [shape: f32[8,16], index: 1, kind: input, shape index: {}]   ;;  %s1148_s2 = inlined_call_operand.vmem [shape: f32[8,1], index: 2, kind: input, shape index: {}]   ;;  %s1149_s3 = inlined_call_operand.hbm [shape: f32[2,8,256], index: 3, kind: output, shape index: {}]  }
   0x1   :  { %10 = vsyncpa [#allocation3 + $0x1], 0 }
   0x2   :  { %11 = vsyncpa [#allocation4], 0 }
   0x3   :  { %13 = vsyncpa [#allocation4 + $0x1], 0  ;;  %s857_s12 = smov 0   ;;  %s859_s13 = smov 0  }
   0x4   :  { %s861_s14 = smov 0   ;;  %s863_s15 = smov 0  }
   0x5 LB: > { %s878_s16 = sadd.s32 4294967295, %s815_s15   ;;  %s620_s17 = sadd.s32 4294967294, %s815_s15   ;;  %s815_s15 = sphi %s863_s15, %s1164_s15   ;;  %s811_s14 = sphi %s861_s14, %s1163_s14   ;;  %s807_s13 = sphi %s859_s13, %s1162_s13   ;;  %s803_s12 = sphi %s857_s12, %s1161_s12  }
   0x6   : > { %s882_s18 = sadd.s32 1, %s815_s15   ;;  %s26_s19 = sadd.s32 1, %s811_s14 }
   0x7   : > { %s23_s20 = ssub.s32 %s815_s15, %s882_s18  ;;  %p33_p0 = scmp.ne.s32.totalorder %s811_s14, %s807_s13 }
   0x8   : > { %p24_p1 = scmp.eq.s32.totalorder %s23_s20, 0  ;;  %p34_p2 = scmp.eq.s32.totalorder %s815_s15, 0 }
   0x9   : > { %p39_p3 = scmp.ne.s32.totalorder %s807_s13, %s803_s12  ;;  %p40_p4 = scmp.eq.s32.totalorder %s878_s16, 0 }
   0xa   : > { %s894_s21 = scalar_select %p24_p1, %s811_s14, %s26_s19  }
   0xb   : > { %p896_p5 = por %p34_p2, %p33_p0  ;;  %p900_p6 = por %p40_p4, %p39_p3 }
   0xc   : > { %p105_p7 = scmp.eq.s32.totalorder %s878_s16, 1  ;;  %p111_p8 = scmp.eq.s32.totalorder %s620_s17, 1 }
   0xd   : > { %p648_p10 = scmp.lt.s32.totalorder %s815_s15, 2  ;;  %s137_s26 = sand.u32 1, %s811_s14  }
   0xe   : > { %p907_p11 = por %p105_p7, %p33_p0  ;;  %p911_p12 = por %p111_p8, %p39_p3 }
   0xf   : > { %s634_s27 = sshll.u32 %s815_s15, 7  ;;  %s623_s28 = sshll.u32 %s137_s26, 3 }
  0x10   : > { %s1153_s24 = scalar_select %p907_p11, 1, 0 }
  0x11   : > { %s1154_s25 = scalar_select %p911_p12, 1, 0 }
  0x12   : > { %s920_s4 = scalar_lea.hbm %s1146_s0, %s634_s27  ;;  %s141_s5 = scalar_lea.vmem [#allocation2], %s623_s28 }
  0x13   : > { %s149_s6 = sshll.u32 %s141_s5, 4  ;;  %p924_p13 = pnand %p648_p10, %p896_p5  ;;  %s928_s6 = int_to_ptr.vmem [resolvable:$true] %s149_s6 }
  0x14   : > { %s138_s8 = scalar_lea.sflag [#allocation3], %s137_s26  ;;  %s719_s9 = scalar_lea.hbm %s920_s4, 128 }
  0x15   : > { %p720_p2 = scmp.ne.s32.totalorder %s920_s4, %s719_s9  ;;  %p721_p3 = pneg %p924_p13 }
  0x16   : > { %s724_s17 = scalar_lea.hbm %s1146_s0, 256  ;;  %p725_p5 = scmp.lt.u32.totalorder %s920_s4, %s1146_s0 }
  0x17   : > { %p722_p4 = pnand %p721_p3, %p720_p2  ;;  %p726_p8 = scmp.lt.u32.totalorder %s724_s17, %s719_s9 }
  0x18   : > { %p728_p9 = scmp.lt.u32.totalorder %s719_s9, %s920_s4 }
  0x19   : > { %p723_p7 = pneg %p722_p4  ;;  %p727_p10 = por %p726_p8, %p725_p5 }
  0x1b   : > { %p729_p0 = por %p728_p9, %p727_p10 }
  0x1d   : > { %p730_p1 = pnand %p729_p0, %p723_p7 }
  0x1f   : > { %733 = shalt.err (!%p730_p1)
}
  0x20   : > { %s734_s22 = scalar_lea.vmem %s928_s6, 128  ;;  %s817_s26 = smov [#allocation2]  }
  0x21   : > { %p735_p2 = scmp.ne.s32.totalorder %s928_s6, %s734_s22  ;;  %s739_s27 = sshll.u32 %s817_s26, 4  ;;  %s740_s27 = int_to_ptr.vmem [resolvable:$false] %s739_s27 }
  0x22   : > { %s741_s28 = scalar_lea.vmem %s740_s27, 256  ;;  %p742_p11 = scmp.lt.s32.totalorder %s928_s6, %s740_s27 }
  0x23   : > { %p737_p4 = pnand %p735_p2, %p721_p3  ;;  %p743_p5 = scmp.lt.s32.totalorder %s741_s28, %s734_s22 }
  0x25   : > { %p738_p12 = pneg %p737_p4  ;;  %p744_p8 = por %p743_p5, %p742_p11 }
  0x27   : > { %p745_p9 = pnand %p744_p8, %p738_p12 }
  0x29   : > { %748 = shalt.err (!%p745_p9)
}
  0x2a   : > { %643 = dma.hbm_to_vmem [thread:$0]  (!%p924_p13), %s920_s4, 128, %s928_s6, %s138_s8  }
  0x2b   : > { %p1156_p0 = scmp.lt.s32.totalorder %s815_s15, 3  ;;  %p1157_p1 = scmp.ge.s32.totalorder %s815_s15, 1 }
  0x2d   : > { %p155_p3 = pnand %p1157_p1, %p1156_p0 }
  0x2e   : > { %s962_s29 = sand.u32 (!%p155_p3), 1, %s807_s13  }
  0x2f   : > { %158 = sbr.rel (%p155_p3) target bundleno = 346 (0x15a), region = 32  ;;  %s627_s30 = sshll.u32 (!%p155_p3), %s962_s29, 3 }
  0x30   : > { %s161_s5 = scalar_lea.sflag (!%p155_p3), [#allocation3], %s962_s29  ;;  %s164_s9 = scalar_lea.vmem (!%p155_p3), [#allocation2], %s627_s30 }
  0x36   : > { %794 = dma.done.wait (%p900_p6), %s161_s5, 128  }
  0x37   : > { %796 = vsyncadd (%p900_p6), %s161_s5, 4294967168  ;;  %v818_v0 = vmov 0   ;;  %v819_v1 = vmov 2   ;;  %v974_v2 = vld [vmem:[%s1147_s1] sm:$0xff]  ;;  %s820_s7 = smov 127   ;;  %v821_v5 = vmov 1   ;;  %v189_v17 = vlaneseq }
  0x38   : > { %700 = vset.pattern.permute.xlu1 %v818_v0  ;;  %702 = vset.pattern.permute.xlu0 %v819_v1  ;;  %v976_v3 = vld [vmem:[%s164_s9] sm:$0xff]  ;;  %s822_s23 = smov 112   ;;  %v823_v6 = vmov 3   ;;  %v824_v7 = vmov 5   ;;  %v825_v8 = vmov 4   ;;  %v826_v9 = vmov 8  }
  0x39   : > { %221 = vrot.lane.b32.xlu0 %v976_v3, %s820_s7  ;;  %v981_v4 = vcombine.high %v976_v3, %v976_v3  ;;  %271 = vperm.xlu1 %700, %v974_v2   ;;  %v827_v10 = vmov 6   ;;  %v828_v11 = vmov 9   ;;  %v829_v12 = vmov 7   ;;  %v188_v30 = vld [vmem:[%s1148_s2] sm:$0xff]  ;;  %s628_s11 = sshll.u32 %s962_s29, 4  ;;  %s635_s17 = sshll.u32 %s878_s16, 8 }
  0x3a   : > { %v830_v13 = vmov 12   ;;  %v831_v14 = vmov 10   ;;  %v832_v15 = vmov 15   ;;  %v833_v16 = vmov 11   ;;  %s186_s19 = scalar_lea.vmem [#allocation5], %s628_s11  ;;  %s1102_s27 = scalar_lea.hbm %s1149_s3, %s635_s17 }
  0x3b   : > { %v190_v18 = vand.u32 127, %v189_v17  ;;  %vm225_vm0 = vcmask 1039360   ;;  %v834_v28 = vmov 13   ;;  %v835_v29 = vmov 14   ;;  %s550_s20 = sshll.u32 %s186_s19, 4  ;;  %s536_s16 = scalar_lea.sflag [#allocation4], %s962_s29  ;;  %s1104_s20 = int_to_ptr.vmem [resolvable:$true] %s550_s20 }
  0x3c   : > { %vm240_vm3 = vcmask 916480   ;;  %v275_v37 = vshrl.u32 %v189_v17, 7  ;;  %vm264_vm4 = vcmask 1043456   ;;  %s749_s28 = scalar_lea.vmem %s1104_s20, 256  ;;  %p1158_p11 = scmp.ne.s32.totalorder %s1153_s24, 0 }
  0x3d   : > { %223 = vrot.lane.b32.xlu0 %v981_v4, %s820_s7  ;;  %701 = vset.pattern.permute.xlu1 %v821_v5  ;;  %v196_v19 = vand.u32 15, %v190_v18  ;;  %v191_v20 = vadd.s32 128, %v190_v18  ;;  %p750_p6 = scmp.ne.s32.totalorder %s1104_s20, %s749_s28  ;;  %s836_s30 = smov [#allocation5]  }
  0x3e   : > { %287 = vperm.xlu1 %701, %v974_v2   ;;  %v1019_v41 = vsub.s32 0, %v275_v37  ;;  %v1021_v42 = vsub.s32 1, %v275_v37  ;;  %v1031_v45 = vsub.s32 2, %v275_v37  ;;  %v1041_v51 = vsub.s32 3, %v275_v37  ;;  %s753_s5 = sshll.u32 %s836_s30, 4  ;;  %s754_s5 = int_to_ptr.vmem [resolvable:$false] %s753_s5 }
  0x3f   : > { %vm216_vm1 = vcmp.ne.s32.totalorder %v196_v19, 15  ;;  %v203_v22 = vand.u32 15, %v191_v20  ;;  %v1051_v62 = vsub.s32 4, %v275_v37  ;;  %v1053_v5 = vsub.s32 5, %v275_v37  ;;  %p751_p12 = pnand %p750_p6, %p1158_p11  ;;  %s755_s9 = scalar_lea.vmem %s754_s5, 512 }
  0x40   : > { %p756_p7 = scmp.lt.s32.totalorder %s1104_s20, %s754_s5  ;;  %p757_p10 = scmp.lt.s32.totalorder %s755_s9, %s749_s28 }
  0x41   : > { %236 = vrot.lane.b32.xlu0 %v976_v3, %s822_s23  ;;  %vm217_vm2 = vcmp.ne.s32.totalorder %v203_v22, 15  ;;  %v1069_v22 = vsub.s32 7, %v275_v37  ;;  %p752_p13 = pneg %p751_p12 }
  0x42   : > { %238 = vrot.lane.b32.xlu1 %v981_v4, %s822_s23  ;;  %p758_p2 = por %p757_p10, %p756_p7 }
  0x43   : > { %703 = vset.pattern.permute.xlu1 %v823_v6 }
  0x44   : > { %p759_p4 = pnand %p758_p2, %p752_p13 }
  0x45   : > { %303 = vperm.xlu0 %702, %v974_v2  }
  0x46   : > { %319 = vperm.xlu1 %703, %v974_v2  }
  0x49   : > { %705 = vset.pattern.permute.xlu0 %v824_v7 }
  0x4a   : > { %704 = vset.pattern.permute.xlu1 %v825_v8  ;;  %351 = vperm.xlu0 %705, %v974_v2  }
  0x4b   : > { %335 = vperm.xlu1 %704, %v974_v2  }
  0x4e   : > { %708 = vset.pattern.permute.xlu0 %v826_v9 }
  0x4f   : > { %706 = vset.pattern.permute.xlu1 %v827_v10  ;;  %399 = vperm.xlu0 %708, %v974_v2  }
  0x50   : > { %367 = vperm.xlu1 %706, %v974_v2  }
  0x53   : > { %709 = vset.pattern.permute.xlu0 %v828_v11 }
  0x54   : > { %707 = vset.pattern.permute.xlu1 %v829_v12  ;;  %415 = vperm.xlu0 %709, %v974_v2  }
  0x55   : > { %383 = vperm.xlu1 %707, %v974_v2  }
  0x58   : > { %712 = vset.pattern.permute.xlu0 %v830_v13  ;;  %v1063_v13 = vsub.s32 6, %v275_v37 }
  0x59   : > { %710 = vset.pattern.permute.xlu1 %v831_v14  ;;  %463 = vperm.xlu0 %712, %v974_v2  }
  0x5a   : > { %431 = vperm.xlu1 %710, %v974_v2  }
  0x5d   : > { %715 = vset.pattern.permute.xlu0 %v832_v15 }
  0x5e   : > { %511 = vperm.xlu0 %715, %v974_v2   ;;  %711 = vset.pattern.permute.xlu1 %v833_v16 }
  0x62   : > { %717 = vset.pattern.permute.xlu0 %v818_v0 }
  0xab   : > { %v222_v21 = vpop.permute.xlu0 %221 }
  0xaf   : > { %v224_v23 = vpop.permute.xlu0 %223 }
  0xb0   : > { %v226_v24 = vsel %vm225_vm0, %v222_v21, %v224_v23  ;;  %v229_v26 = vsel %vm225_vm0, %v224_v23, 0.0 }
  0xb1   : > { %v1002_v25 = vsel %vm216_vm1, %v226_v24, 0.0  ;;  %v1006_v27 = vsel %vm217_vm2, %v229_v26, 0.0 }
  0xb2   : > { %246 = vrot.lane.b32.xlu1 %v1002_v25, %s822_s23 }
  0xb3   : > { %v237_v33 = vpop.permute.xlu0 %236 }
  0xb6   : > { %248 = vrot.lane.b32.xlu1 %v1006_v27, %s822_s23 }
  0xb8   : > { %v272_v31 = vpop.permute.xlu1 %271 }
  0xba   : > { %447 = vperm.xlu1 %711, %v974_v2  }
  0xbd   : > { %v288_v32 = vpop.permute.xlu1 %287 }
  0xbe   : > { %713 = vset.pattern.permute.xlu1 %v834_v28 }
  0xbf   : > { %479 = vperm.xlu1 %713, %v974_v2  }
  0xc1   : > { %v239_v34 = vpop.permute.xlu1 %238 }
  0xc2   : > { %v241_v35 = vsel %vm240_vm3, %v237_v33, %v239_v34  ;;  %v243_v36 = vsel %vm240_vm3, %v239_v34, 0.0 }
  0xc3   : > { %714 = vset.pattern.permute.xlu1 %v835_v29  ;;  %v255_v38 = vrot.slane %v241_v35, 4  ;;  %v256_v39 = vrot.slane %v243_v36, 4 }
  0xc4   : > { %495 = vperm.xlu1 %714, %v974_v2   ;;  %v304_v58 = vpop.permute.xlu0 %303 }
  0xc5   : > { %v320_v40 = vpop.permute.xlu1 %319  ;;  %v1025_v43 = vsel %vm264_vm4, %v976_v3, %v255_v38  ;;  %v1029_v44 = vsel %vm264_vm4, %v981_v4, %v256_v39 }
  0xc6   : > { %v277_v47 = vrot.slane %v1025_v43, %v1019_v41  ;;  %v281_v48 = vrot.slane %v1029_v44, %v1019_v41  ;;  %v293_v49 = vrot.slane %v1025_v43, %v1021_v42  ;;  %v297_v50 = vrot.slane %v1029_v44, %v1021_v42 }
  0xc7   : > { %v309_v52 = vrot.slane %v1025_v43, %v1031_v45  ;;  %v313_v53 = vrot.slane %v1029_v44, %v1031_v45  ;;  %v325_v60 = vrot.slane %v1025_v43, %v1041_v51  ;;  %v329_v61 = vrot.slane %v1029_v44, %v1041_v51 }
  0xc8   : > { %716 = vset.pattern.permute.xlu1 %v818_v0  ;;  %v282_v54 = vmul.f32 %v277_v47, %v272_v31  ;;  %v283_v55 = vmul.f32 %v281_v48, %v272_v31  ;;  %v298_v56 = vmul.f32 %v293_v49, %v288_v32  ;;  %v299_v57 = vmul.f32 %v297_v50, %v288_v32 }
  0xc9   : > { %528 = vperm.xlu1 %716, %v188_v30   ;;  %v314_v1 = vmul.f32 %v309_v52, %v304_v58  ;;  %v315_v2 = vmul.f32 %v313_v53, %v304_v58  ;;  %v330_v3 = vmul.f32 %v325_v60, %v320_v40  ;;  %v331_v4 = vmul.f32 %v329_v61, %v320_v40  ;;  %v352_v19 = vpop.permute.xlu0 %351 }
  0xca   : > { %v336_v46 = vpop.permute.xlu1 %335  ;;  %v300_v63 = vadd.f32 %v298_v56, %v282_v54  ;;  %v301_v0 = vadd.f32 %v299_v57, %v283_v55  ;;  %v341_v9 = vrot.slane %v1025_v43, %v1051_v62  ;;  %v345_v10 = vrot.slane %v1029_v44, %v1051_v62 }
  0xcb   : > { %v357_v11 = vrot.slane %v1025_v43, %v1053_v5  ;;  %v361_v12 = vrot.slane %v1029_v44, %v1053_v5  ;;  %v373_v20 = vrot.slane %v1025_v43, %v1063_v13  ;;  %v377_v21 = vrot.slane %v1029_v44, %v1063_v13 }
  0xcc   : > { %v316_v7 = vadd.f32 %v314_v1, %v300_v63  ;;  %v317_v8 = vadd.f32 %v315_v2, %v301_v0  ;;  %v346_v17 = vmul.f32 %v341_v9, %v336_v46  ;;  %v347_v18 = vmul.f32 %v345_v10, %v336_v46 }
  0xcd   : > { %v362_v26 = vmul.f32 %v357_v11, %v352_v19  ;;  %v363_v28 = vmul.f32 %v361_v12, %v352_v19  ;;  %v389_v30 = vrot.slane %v1025_v43, %v1069_v22  ;;  %v393_v31 = vrot.slane %v1029_v44, %v1069_v22 }
  0xce   : > { %v332_v15 = vadd.f32 %v330_v3, %v316_v7  ;;  %v333_v16 = vadd.f32 %v331_v4, %v317_v8  ;;  %v400_v50 = vpop.permute.xlu0 %399 }
  0xcf   : > { %v368_v59 = vpop.permute.xlu1 %367 }
  0xd0   : > { %v348_v23 = vadd.f32 %v346_v17, %v332_v15  ;;  %v349_v24 = vadd.f32 %v347_v18, %v333_v16  ;;  %v378_v34 = vmul.f32 %v373_v20, %v368_v59  ;;  %v379_v35 = vmul.f32 %v377_v21, %v368_v59 }
  0xd2   : > { %v364_v32 = vadd.f32 %v362_v26, %v348_v23  ;;  %v365_v33 = vadd.f32 %v363_v28, %v349_v24 }
  0xd3   : > { %v416_v63 = vpop.permute.xlu0 %415 }
  0xd4   : > { %v384_v6 = vpop.permute.xlu1 %383  ;;  %v380_v46 = vadd.f32 %v378_v34, %v364_v32  ;;  %v381_v47 = vadd.f32 %v379_v35, %v365_v33 }
  0xd5   : > { %v394_v48 = vmul.f32 %v389_v30, %v384_v6  ;;  %v395_v49 = vmul.f32 %v393_v31, %v384_v6 }
  0xd7   : > { %v396_v54 = vadd.f32 %v394_v48, %v380_v46  ;;  %v397_v55 = vadd.f32 %v395_v49, %v381_v47 }
  0xd8   : > { %v464_v17 = vpop.permute.xlu0 %463 }
  0xd9   : > { %v432_v14 = vpop.permute.xlu1 %431 }
  0xdd   : > { %v512_v31 = vpop.permute.xlu0 %511 }
 0x124   : > { %v247_v29 = vpop.permute.xlu1 %246 }
 0x128   : > { %v249_v36 = vpop.permute.xlu1 %248 }
 0x129   : > { %v250_v38 = vsel %vm240_vm3, %v247_v29, %v249_v36  ;;  %v252_v37 = vsel %vm240_vm3, %v249_v36, 0.0 }
 0x12a   : > { %v260_v39 = vrot.slane %v250_v38, 4  ;;  %v261_v40 = vrot.slane %v252_v37, 4 }
 0x12c   : > { %v267_v43 = vsel %vm264_vm4, %v1002_v25, %v260_v39  ;;  %v268_v44 = vsel %vm264_vm4, %v1006_v27, %v261_v40 }
 0x12d   : > { %v405_v52 = vrot.slane %v267_v43, %v1019_v41  ;;  %v409_v53 = vrot.slane %v268_v44, %v1019_v41  ;;  %v421_v58 = vrot.slane %v267_v43, %v1021_v42  ;;  %v425_v59 = vrot.slane %v268_v44, %v1021_v42 }
 0x12e   : > { %v437_v27 = vrot.slane %v267_v43, %v1031_v45  ;;  %v441_v1 = vrot.slane %v268_v44, %v1031_v45  ;;  %v453_v6 = vrot.slane %v267_v43, %v1041_v51  ;;  %v457_v7 = vrot.slane %v268_v44, %v1041_v51 }
 0x12f   : > { %v410_v56 = vmul.f32 %v405_v52, %v400_v50  ;;  %v411_v57 = vmul.f32 %v409_v53, %v400_v50  ;;  %v426_v25 = vmul.f32 %v421_v58, %v416_v63  ;;  %v427_v0 = vmul.f32 %v425_v59, %v416_v63 }
 0x130   : > { %v442_v41 = vmul.f32 %v437_v27, %v432_v14  ;;  %v443_v4 = vmul.f32 %v441_v1, %v432_v14  ;;  %v469_v8 = vrot.slane %v267_v43, %v1051_v62  ;;  %v473_v42 = vrot.slane %v268_v44, %v1051_v62 }
 0x131   : > { %v412_v60 = vadd.f32 %v410_v56, %v396_v54  ;;  %v413_v61 = vadd.f32 %v411_v57, %v397_v55  ;;  %v485_v14 = vrot.slane %v267_v43, %v1053_v5  ;;  %v489_v20 = vrot.slane %v268_v44, %v1053_v5 }
 0x132   : > { %v474_v18 = vmul.f32 %v469_v8, %v464_v17  ;;  %v475_v19 = vmul.f32 %v473_v42, %v464_v17  ;;  %v517_v26 = vrot.slane %v267_v43, %v1069_v22  ;;  %v521_v28 = vrot.slane %v268_v44, %v1069_v22 }
 0x133   : > { %v428_v2 = vadd.f32 %v426_v25, %v412_v60  ;;  %v429_v3 = vadd.f32 %v427_v0, %v413_v61  ;;  %v501_v29 = vrot.slane %v267_v43, %v1063_v13  ;;  %v505_v30 = vrot.slane %v268_v44, %v1063_v13 }
 0x134   : > { %v522_v36 = vmul.f32 %v517_v26, %v512_v31  ;;  %v523_v38 = vmul.f32 %v521_v28, %v512_v31 }
 0x135   : > { %v444_v10 = vadd.f32 %v442_v41, %v428_v2  ;;  %v445_v11 = vadd.f32 %v443_v4, %v429_v3 }
 0x139   : > { %v448_v9 = vpop.permute.xlu1 %447 }
 0x13a   : > { %v458_v12 = vmul.f32 %v453_v6, %v448_v9  ;;  %v459_v15 = vmul.f32 %v457_v7, %v448_v9 }
 0x13c   : > { %v460_v16 = vadd.f32 %v458_v12, %v444_v10  ;;  %v461_v45 = vadd.f32 %v459_v15, %v445_v11 }
 0x13e   : > { %v480_v51 = vpop.permute.xlu1 %479  ;;  %v476_v21 = vadd.f32 %v474_v18, %v460_v16  ;;  %v477_v23 = vadd.f32 %v475_v19, %v461_v45 }
 0x13f   : > { %v490_v24 = vmul.f32 %v485_v14, %v480_v51  ;;  %v491_v62 = vmul.f32 %v489_v20, %v480_v51 }
 0x141   : > { %v492_v33 = vadd.f32 %v490_v24, %v476_v21  ;;  %v493_v34 = vadd.f32 %v491_v62, %v477_v23 }
 0x143   : > { %v496_v32 = vpop.permute.xlu1 %495 }
 0x144   : > { %v506_v5 = vmul.f32 %v501_v29, %v496_v32  ;;  %v507_v35 = vmul.f32 %v505_v30, %v496_v32 }
 0x146   : > { %v508_v37 = vadd.f32 %v506_v5, %v492_v33  ;;  %v509_v39 = vadd.f32 %v507_v35, %v493_v34 }
 0x148   : > { %v524_v22 = vadd.f32 %v522_v36, %v508_v37  ;;  %v525_v40 = vadd.f32 %v523_v38, %v509_v39  ;;  %v529_v46 = vpop.permute.xlu1 %528 }
 0x14a   : > { %v531_v47 = vadd.f32 %v529_v46, %v524_v22  ;;  %v532_v13 = vadd.f32 %v529_v46, %v525_v40 }
 0x14c   : > { %533 = vst [vmem:[%s186_s19] sm:$0xff] %v531_v47  ;;  %534 = vst [vmem:[%s186_s19 + $0x8] sm:$0xff] %v532_v13 }
 0x14d   : > { %762 = shalt.err (!%p759_p4)
}
 0x14e   : > { %s763_s29 = scalar_lea.hbm %s1102_s27, 256  ;;  %s767_s7 = scalar_lea.hbm %s1149_s3, 512 }
 0x14f   : > { %p764_p5 = scmp.ne.s32.totalorder %s1102_s27, %s763_s29  ;;  %p768_p0 = scmp.lt.u32.totalorder %s1102_s27, %s1149_s3 }
 0x150   : > { %p769_p1 = scmp.lt.u32.totalorder %s767_s7, %s763_s29  ;;  %p771_p6 = scmp.lt.u32.totalorder %s763_s29, %s1102_s27 }
 0x151   : > { %p765_p8 = pnand %p764_p5, %p1158_p11 }
 0x152   : > { %p770_p3 = por %p769_p1, %p768_p0 }
 0x153   : > { %p766_p9 = pneg %p765_p8 }
 0x154   : > { %p772_p12 = por %p771_p6, %p770_p3 }
 0x156   : > { %p773_p13 = pnand %p772_p12, %p766_p9 }
 0x158   : > { %776 = shalt.err (!%p773_p13)
}
 0x159   : > { %638 = dma.vmem_to_hbm [thread:$0]  (%p1158_p11), %s1104_s20, 256, %s1102_s27, %s536_s16  }
 0x15a PF: > { %s562_s10 = sand.u32 1, %s803_s12   ;;  %p1159_p7 = scmp.ne.s32.totalorder %s1154_s25, 0 }
 0x15b   : > { %p1160_p10 = scmp.ge.s32.totalorder %s815_s15, 2  ;;  %s563_s11 = scalar_lea.sflag [#allocation4], %s562_s10 }
 0x15d   : > { %p645_p2 = pnand %p1160_p10, %p1159_p7 }
 0x15f   : > { %798 = dma.done.wait (!%p645_p2), %s563_s11, 256  }
 0x160   : > { %800 = vsyncadd (!%p645_p2), %s563_s11, 4294967040  ;;  %p16_p4 = scmp.ge.s32.totalorder %s882_s18, 4   ;;  %s1161_s12 = smov %s807_s13 }
 0x161   : > { %s1162_s13 = smov %s811_s14  ;;  %s1163_s14 = smov %s894_s21 }
 0x162   : > { %s1164_s15 = smov %s882_s18  ;;  %18 = sbr.rel (!%p16_p4) target bundleno = 5 (0x5), region = 77 }
 0x169   :  { %568 = vsyncpa [#allocation3], 1 }
 0x16a   :  { %570 = vsyncpa [#allocation3 + $0x1], 1 }
 0x16b   :  { %571 = vsyncpa [#allocation4], 1 }
 0x16c   :  { %573 = vsyncpa [#allocation4 + $0x1], 1 }

</bundles_post_ra>
